<compile_context>
chip_gen: v6e
topology: v6e:2x2x1
jax: 0.10.0
libtpu: 0.0.40
codegen_flags: <defaults>
</compile_context>

<pallas_src>
import functools

import jax
import jax.numpy as jnp
from jax.experimental import pallas as pl
from jax.experimental.pallas import tpu as pltpu


def _multi_branch_kernel(xT_ref, w_ref, b_ref, o_ref, *, H, nIn, nOut):
    """xT_ref: (nIn, TM) feature-major node tile.
    w_ref:  (4H+nOut, 2H) packed, zero-padded weight slab (resident).
            rows [0,2H)    : merged branch weights, K = nIn
            rows [2H,3H)   : lin1,                  K = 2H
            rows [3H,4H)   : lin2,                  K = H
            rows [4H,4H+nOut): lin3,                K = H
    b_ref:  (4H+nOut, 1) packed biases (f32, resident).
    o_ref:  (nOut, TM) lane-dense output tile.
    """
    wdt = w_ref.dtype
    x = xT_ref[...]                                   # (nIn, TM)

    # Both branch surrogates in one matmul (rows 0..H-1 branch1, H..2H-1 branch2).
    z = jnp.dot(w_ref[0:2 * H, 0:nIn], x,
                preferred_element_type=jnp.float32) + b_ref[0:2 * H, :]
    z = jnp.maximum(z, 0.0)                           # (2H, TM) f32

    # Head: lin1 over the (already stacked) concat, relu.
    h = jnp.dot(w_ref[2 * H:3 * H, 0:2 * H], z.astype(wdt),
                preferred_element_type=jnp.float32) + b_ref[2 * H:3 * H, :]
    h = jnp.maximum(h, 0.0)                           # (H, TM) f32

    h = jnp.dot(w_ref[3 * H:4 * H, 0:H], h.astype(wdt),
                preferred_element_type=jnp.float32) + b_ref[3 * H:4 * H, :]
    h = jnp.maximum(h, 0.0)                           # (H, TM) f32

    out = jnp.dot(w_ref[4 * H:4 * H + nOut, 0:H], h.astype(wdt),
                  preferred_element_type=jnp.float32) + b_ref[4 * H:4 * H + nOut, :]
    o_ref[...] = out.astype(o_ref.dtype)              # (nOut, TM) lane-dense store


def _pick_tile_m(N):
    """Tile-size heuristic per the perf review:
    - target an even block count of 2 (one slab per TC on v7x megacore; only
      ~2 grid steps of overhead on single-TC v5e/v6e),
    - multiple of 256 (v6e/v7x MXU lane groups; also a multiple of 128 for v5e),
    - cap at 8192 so x/out double-buffers + ~128*TM*4 B of temporaries stay
      far under v7x's 32 MiB scoped-VMEM default (v5e/v6e have 4x the VMEM).
    """
    TM_CAP = 8192
    tm = -(-N // 2)              # ceil(N / 2): 2 blocks
    tm = -(-tm // 256) * 256     # round up to multiple of 256
    return max(256, min(tm, TM_CAP))


def multi_branch_net(x, params, *, tile_m=None, use_bf16=False):
    """x: (N, nIn) float32, node-major. Returns (N, nOut) float32."""
    N, nIn = x.shape
    H = params["H"]
    nOut = params["nOut"]

    if tile_m is None:
        tile_m = _pick_tile_m(N)
    n_blocks = pl.cdiv(N, tile_m)
    n_pad = n_blocks * tile_m

    # Layout plumbing only (pad + transpose in one expression so XLA fuses it).
    xT = jnp.pad(x, ((0, n_pad - N), (0, 0))).T        # (nIn, n_pad)

    wslab = params["wslab"]                            # (4H+nOut, 2H)
    bslab = params["bslab"]                            # (4H+nOut, 1) f32
    if use_bf16:
        # MXU-only bf16: accumulation stays f32, bias add / ReLU stay f32.
        xT = xT.astype(jnp.bfloat16)
        wslab = wslab.astype(jnp.bfloat16)

    def resident(arr):
        # Constant block index -> stays resident in VMEM across the grid.
        return pl.BlockSpec(arr.shape, lambda i: (0, 0))

    in_specs = [
        pl.BlockSpec((nIn, tile_m), lambda i: (0, i)),  # xT node tile
        resident(wslab),
        resident(bslab),
    ]
    out_spec = pl.BlockSpec((nOut, tile_m), lambda i: (0, i))

    # Advisory cost so XLA does not mis-schedule this tiny custom call.
    flops = 2 * N * (2 * H * nIn + H * (2 * H) + H * H + nOut * H)
    bytes_accessed = (N * (nIn + nOut) + wslab.size + bslab.size) * 4
    cost = pl.CostEstimate(flops=flops, transcendentals=0,
                           bytes_accessed=bytes_accessed)

    kernel = functools.partial(_multi_branch_kernel, H=H, nIn=nIn, nOut=nOut)

    outT = pl.pallas_call(
        kernel,
        out_shape=jax.ShapeDtypeStruct((nOut, n_pad), jnp.float32),
        grid_spec=pltpu.PrefetchScalarGridSpec(
            num_scalar_prefetch=0,
            grid=(n_blocks,),
            in_specs=in_specs,
            out_specs=out_spec,
        ),
        compiler_params=pltpu.CompilerParams(
            dimension_semantics=("parallel",),  # node blocks shard across TCs (v7x)
        ),
        cost_estimate=cost,
    )(xT, wslab, bslab)

    return outT[:, :N].T  # crop padding, back to node-major (N, nOut)


def init_params(key, nIn, nOut, nhidden):
    """Deterministic init. Weights PyTorch-style (out, in); biases (out, 1).
    Also builds the packed weight/bias slabs consumed by the kernel."""
    assert nhidden % 8 == 0, "nhidden must be a multiple of 8 for sublane-aligned slab slices"
    ks = jax.random.split(key, 5)

    def linear(k, fan_in, fan_out):
        kw, kb = jax.random.split(k)
        bound = 1.0 / jnp.sqrt(fan_in)
        w = jax.random.uniform(kw, (fan_out, fan_in), jnp.float32, -bound, bound)
        b = jax.random.uniform(kb, (fan_out, 1), jnp.float32, -bound, bound)
        return w, b

    H = nhidden
    wb1, bb1 = linear(ks[0], nIn, H)        # branch1 surrogate
    wb2, bb2 = linear(ks[1], nIn, H)        # branch2 surrogate
    w1, b1 = linear(ks[2], 2 * H, H)        # lin1: (H, 2H)
    w2, b2 = linear(ks[3], H, H)            # lin2
    w3, b3 = linear(ks[4], H, nOut)         # lin3

    wb = jnp.concatenate([wb1, wb2], axis=0)            # (2H, nIn)
    bb = jnp.concatenate([bb1, bb2], axis=0)            # (2H, 1)

    # Packed resident slabs: one weight operand, one bias operand.
    K_max = max(nIn, 2 * H, H)
    rows = 4 * H + nOut
    wslab = jnp.zeros((rows, K_max), jnp.float32)
    wslab = wslab.at[0:2 * H, 0:nIn].set(wb)
    wslab = wslab.at[2 * H:3 * H, 0:2 * H].set(w1)
    wslab = wslab.at[3 * H:4 * H, 0:H].set(w2)
    wslab = wslab.at[4 * H:4 * H + nOut, 0:H].set(w3)
    bslab = jnp.concatenate([bb, b1, b2, b3], axis=0)    # (rows, 1)

    return {
        "H": H, "nOut": nOut,
        "wslab": wslab, "bslab": bslab,
        # unpacked copies kept only for the pure-JAX reference
        "wb": wb, "bb": bb, "w1": w1, "b1": b1,
        "w2": w2, "b2": b2, "w3": w3, "b3": b3,
    }


def reference(x, p):
    """Plain-JAX node-major reference of the same forward."""
    z = jnp.maximum(x @ p["wb"].T + p["bb"].T, 0.0)     # branches + concat
    h = jnp.maximum(z @ p["w1"].T + p["b1"].T, 0.0)     # lin1 + relu
    h = jnp.maximum(h @ p["w2"].T + p["b2"].T, 0.0)     # lin2 + relu
    return h @ p["w3"].T + p["b3"].T                    # lin3


if __name__ == "__main__":
    key = jax.random.PRNGKey(0)
    k_x, k_p = jax.random.split(key)

    # Small graph: 2000 nodes (non-multiple of the tile to exercise pad/crop),
    # 4 input features, hidden 32, 2 outputs.  Auto tile -> 1024, 2 blocks.
    N, nIn, nhidden, nOut = 2000, 4, 32, 2
    x = jax.random.normal(k_x, (N, nIn), dtype=jnp.float32)
    params = init_params(k_p, nIn, nOut, nhidden)

    out = multi_branch_net(x, params)          # f32 path (bf16 available via use_bf16=True)
    out = jax.block_until_ready(out)

    ref = reference(x, params)
    assert out.shape == (N, nOut)
    assert jnp.allclose(out, ref, atol=1e-5, rtol=1e-5), "mismatch vs reference"

    print("KERNEL_OK")
</pallas_src>

<mosaic_0001>
module attributes {stable_mosaic.version = 11 : i64} {
  func.func @_multi_branch_kernel(%arg0: i32, %arg1: memref<4x1024xf32, #tpu.memory_space<vmem>>, %arg2: memref<130x64xf32, #tpu.memory_space<vmem>>, %arg3: memref<130x1xf32, #tpu.memory_space<vmem>>, %arg4: memref<2x1024xf32, #tpu.memory_space<vmem>>) attributes {dimension_semantics = [#tpu.dimension_semantics<parallel>], iteration_bounds = array<i64: 2>, scalar_prefetch = 0 : i64, scratch_operands = 0 : i64, tpu.core_type = #tpu.core_type<tc>, window_params = [{transform_indices = @transform_0, window_bounds = array<i64: 4, 1024>}, {pipeline_mode = #tpu.pipeline_mode<synchronous>, transform_indices = @transform_1, window_bounds = array<i64: 130, 64>}, {pipeline_mode = #tpu.pipeline_mode<synchronous>, transform_indices = @transform_2, window_bounds = array<i64: 130, 1>}, {transform_indices = @transform_3, window_bounds = array<i64: 2, 1024>}]} {
    %c0 = arith.constant 0 : index
    %c0_0 = arith.constant 0 : index
    %0 = vector.load %arg1[%c0, %c0_0] : memref<4x1024xf32, #tpu.memory_space<vmem>>, vector<4x1024xf32>
    %c0_1 = arith.constant 0 : index
    %c0_2 = arith.constant 0 : index
    %1 = vector.load %arg2[%c0_1, %c0_2] : memref<130x64xf32, #tpu.memory_space<vmem>>, vector<64x4xf32>
    %cst = arith.constant dense<0.000000e+00> : vector<64x1024xf32>
    %2 = tpu.matmul %1, %0, %cst {dimension_numbers = #tpu.dot_dimension_numbers<[1], [0], [0], [1], [0, 0, 1, 1], [], []>} : vector<64x4xf32>, vector<4x1024xf32>, vector<64x1024xf32> -> vector<64x1024xf32>
    %c0_3 = arith.constant 0 : index
    %c0_4 = arith.constant 0 : index
    %3 = vector.load %arg3[%c0_3, %c0_4] : memref<130x1xf32, #tpu.memory_space<vmem>>, vector<64x1xf32>
    %4 = vector.broadcast %3 : vector<64x1xf32> to vector<64x1024xf32>
    %5 = arith.addf %2, %4 : vector<64x1024xf32>
    %cst_5 = arith.constant 0.000000e+00 : f32
    %6 = vector.broadcast %cst_5 : f32 to vector<64x1024xf32>
    %7 = arith.maximumf %5, %6 : vector<64x1024xf32>
    %c64 = arith.constant 64 : index
    %c0_6 = arith.constant 0 : index
    %8 = vector.load %arg2[%c64, %c0_6] : memref<130x64xf32, #tpu.memory_space<vmem>>, vector<32x64xf32>
    %cst_7 = arith.constant dense<0.000000e+00> : vector<32x1024xf32>
    %9 = tpu.matmul %8, %7, %cst_7 {dimension_numbers = #tpu.dot_dimension_numbers<[1], [0], [0], [1], [0, 0, 1, 1], [], []>} : vector<32x64xf32>, vector<64x1024xf32>, vector<32x1024xf32> -> vector<32x1024xf32>
    %c64_8 = arith.constant 64 : index
    %c0_9 = arith.constant 0 : index
    %10 = vector.load %arg3[%c64_8, %c0_9] : memref<130x1xf32, #tpu.memory_space<vmem>>, vector<32x1xf32>
    %11 = vector.broadcast %10 : vector<32x1xf32> to vector<32x1024xf32>
    %12 = arith.addf %9, %11 : vector<32x1024xf32>
    %cst_10 = arith.constant 0.000000e+00 : f32
    %13 = vector.broadcast %cst_10 : f32 to vector<32x1024xf32>
    %14 = arith.maximumf %12, %13 : vector<32x1024xf32>
    %c96 = arith.constant 96 : index
    %c0_11 = arith.constant 0 : index
    %15 = vector.load %arg2[%c96, %c0_11] : memref<130x64xf32, #tpu.memory_space<vmem>>, vector<32x32xf32>
    %cst_12 = arith.constant dense<0.000000e+00> : vector<32x1024xf32>
    %16 = tpu.matmul %15, %14, %cst_12 {dimension_numbers = #tpu.dot_dimension_numbers<[1], [0], [0], [1], [0, 0, 1, 1], [], []>} : vector<32x32xf32>, vector<32x1024xf32>, vector<32x1024xf32> -> vector<32x1024xf32>
    %c96_13 = arith.constant 96 : index
    %c0_14 = arith.constant 0 : index
    %17 = vector.load %arg3[%c96_13, %c0_14] : memref<130x1xf32, #tpu.memory_space<vmem>>, vector<32x1xf32>
    %18 = vector.broadcast %17 : vector<32x1xf32> to vector<32x1024xf32>
    %19 = arith.addf %16, %18 : vector<32x1024xf32>
    %cst_15 = arith.constant 0.000000e+00 : f32
    %20 = vector.broadcast %cst_15 : f32 to vector<32x1024xf32>
    %21 = arith.maximumf %19, %20 : vector<32x1024xf32>
    %c128 = arith.constant 128 : index
    %c0_16 = arith.constant 0 : index
    %22 = vector.load %arg2[%c128, %c0_16] : memref<130x64xf32, #tpu.memory_space<vmem>>, vector<2x32xf32>
    %cst_17 = arith.constant dense<0.000000e+00> : vector<2x1024xf32>
    %23 = tpu.matmul %22, %21, %cst_17 {dimension_numbers = #tpu.dot_dimension_numbers<[1], [0], [0], [1], [0, 0, 1, 1], [], []>} : vector<2x32xf32>, vector<32x1024xf32>, vector<2x1024xf32> -> vector<2x1024xf32>
    %c128_18 = arith.constant 128 : index
    %c0_19 = arith.constant 0 : index
    %24 = vector.load %arg3[%c128_18, %c0_19] : memref<130x1xf32, #tpu.memory_space<vmem>>, vector<2x1xf32>
    %25 = vector.broadcast %24 : vector<2x1xf32> to vector<2x1024xf32>
    %26 = arith.addf %23, %25 : vector<2x1024xf32>
    %c0_20 = arith.constant 0 : index
    %c0_21 = arith.constant 0 : index
    %27 = vector.load %arg4[%c0_20, %c0_21] : memref<2x1024xf32, #tpu.memory_space<vmem>>, vector<2x1024xf32>
    tpu.vector_store %arg4[%c0_20, %c0_21], %26 {strides = array<i32>} : memref<2x1024xf32, #tpu.memory_space<vmem>>, vector<2x1024xf32>,
    return
  }
  func.func @transform_0(%arg0: i32) -> (i32, i32) {
    %c0_i32 = arith.constant 0 : i32
    %c0_i32_0 = arith.constant 0 : i32
    return %c0_i32, %arg0 : i32, i32
  }
  func.func @transform_1(%arg0: i32) -> (i32, i32) {
    %c0_i32 = arith.constant 0 : i32
    %c0_i32_0 = arith.constant 0 : i32
    %c0_i32_1 = arith.constant 0 : i32
    return %c0_i32, %c0_i32_0 : i32, i32
  }
  func.func @transform_2(%arg0: i32) -> (i32, i32) {
    %c0_i32 = arith.constant 0 : i32
    %c0_i32_0 = arith.constant 0 : i32
    %c0_i32_1 = arith.constant 0 : i32
    return %c0_i32, %c0_i32_0 : i32, i32
  }
  func.func @transform_3(%arg0: i32) -> (i32, i32) {
    %c0_i32 = arith.constant 0 : i32
    %c0_i32_0 = arith.constant 0 : i32
    return %c0_i32, %arg0 : i32, i32
  }
}

</mosaic_0001>

<bundles_post_ra>
// kernel: tpu_custom_call.1
= control target key start
LH: loop header
LB: loop body
LE: loop exit
PB: predicated region body
PF: predicated region fallthrough
CT: control target
= control target key end

     0   :  { %8 = vsyncpa [#allocation3], 0  ;;  %s2957_s0 = inlined_call_operand.vmem [shape: f32[4,2048], index: 0, kind: input, shape index: {}]   ;;  %s2958_s1 = inlined_call_operand.vmem [shape: f32[130,64], index: 1, kind: input, shape index: {}]   ;;  %s2959_s2 = inlined_call_operand.vmem [shape: f32[130,1], index: 2, kind: input, shape index: {}]   ;;  %s2960_s3 = inlined_call_operand.hbm [shape: f32[2,2048], index: 3, kind: output, shape index: {}]  }
   0x1   :  { %10 = vsyncpa [#allocation3 + $0x1], 0  ;;  %s2293_s12 = smov 0   ;;  %s2295_s13 = smov 0  }
   0x2   :  { %s2297_s14 = smov 0   ;;  %s2299_s15 = smov 0  }
   0x3 LB: > { %s2314_s16 = sadd.s32 4294967295, %s2267_s15   ;;  %s2070_s17 = sadd.s32 4294967294, %s2267_s15   ;;  %s2267_s15 = sphi %s2299_s15, %s2966_s15   ;;  %s2263_s14 = sphi %s2297_s14, %s2965_s14   ;;  %s2259_s13 = sphi %s2295_s13, %s2964_s13   ;;  %s2255_s12 = sphi %s2293_s12, %s2963_s12  }
   0x4   : > { %s2318_s18 = sadd.s32 1, %s2267_s15   ;;  %s91_s19 = sadd.s32 1, %s2263_s14 }
   0x5   : > { %s88_s20 = ssub.s32 %s2267_s15, %s2318_s18  ;;  %p101_p0 = scmp.ne.s32.totalorder %s2263_s14, %s2259_s13 }
   0x6   : > { %p89_p1 = scmp.eq.s32.totalorder %s88_s20, 0  ;;  %p102_p2 = scmp.eq.s32.totalorder %s2314_s16, 1 }
   0x7   : > { %p107_p3 = scmp.ne.s32.totalorder %s2259_s13, %s2255_s12  ;;  %p108_p4 = scmp.eq.s32.totalorder %s2070_s17, 1 }
   0x8   : > { %s2329_s21 = scalar_select %p89_p1, %s2263_s14, %s91_s19  }
   0x9   : > { %p2331_p5 = por %p102_p2, %p101_p0  ;;  %p2335_p6 = por %p108_p4, %p107_p3 }
   0xa   : > { %p2073_p7 = scmp.ge.s32.totalorder %s2267_s15, 1  ;;  %p141_p8 = scmp.lt.s32.totalorder %s2267_s15, 3 }
   0xc   : > { %p142_p9 = pnand %p2073_p7, %p141_p8 }
   0xd   : > { %s2075_s24 = sshll.u32 (!%p142_p9), %s2314_s16, 3  ;;  %s162_s25 = sand.u32 (!%p142_p9), 1, %s2259_s13  }
   0xe   : > { %145 = sbr.rel (%p142_p9) target bundleno = 957 (0x3bd), region = 32  ;;  %p166_p10 = scmp.lt.s32.totalorder (!%p142_p9), %s2075_s24, 15 }
   0xf   : > { %s2074_s26 = sshll.u32 (!%p142_p9), %s162_s25, 4  ;;  %s2158_s28 = sshll.u32 (!%p142_p9), %s2314_s16, 8 }
  0x10   : > { %s164_s27 = scalar_lea.vmem (!%p142_p9), [#allocation2], %s2074_s26  ;;  %s2009_s5 = scalar_lea.hbm (!%p142_p9), %s2960_s3, %s2158_s28 }
  0x11   : > { %s1997_s6 = scalar_lea.sflag (!%p142_p9), [#allocation3], %s162_s25  ;;  %s2272_s8 = smov (!%p142_p9), [#allocation2]  }
  0x13   : > { %v2269_v0 = vmov 0.0   ;;  %v2270_v1 = vmov 0   ;;  %s2968_s24 = smov (!%p166_p10, %s2075_s24), 15  ;;  %v189_v2 = vld [vmem:[%s2959_s2 + $0x28] sm:$0xff]  ;;  %v191_v3 = vld [vmem:[%s2959_s2 + $0x38] sm:$0xff]  ;;  %v188_v4 = vld [vmem:[%s2959_s2 + $0x20] sm:$0xff] }
  0x14   : > { %346 = vmatprep.mubr.f32.mxu0 %v2269_v0  ;;  %459 = vmatprep.mubr.f32.mxu1 %v2269_v0  ;;  %s2076_s29 = sshll.u32 %s2968_s24, 2  ;;  %v190_v5 = vld [vmem:[%s2959_s2 + $0x30] sm:$0xff]  ;;  %vm265_vm0 = vcmask 1043456   ;;  %v2362_v12 = vld [vmem:[%s2958_s1] sm:$0xff]  ;;  %vm240_vm1 = vcmask 31744   ;;  %v2377_v15 = vld [vmem:[%s2958_s1 + $0x8] sm:$0xff] }
  0x15   : > { %2202 = vset.pattern.permute.xlu1 %v2270_v1  ;;  %2201 = vset.pattern.permute.xlu0 %v2270_v1  ;;  %s169_s9 = scalar_lea.vmem %s2957_s0, %s2076_s29  ;;  %v186_v16 = vld [vmem:[%s2959_s2 + $0x10] sm:$0xff]  ;;  %v187_v17 = vld [vmem:[%s2959_s2 + $0x18] sm:$0xff]  ;;  %v184_v19 = vld [vmem:[%s2959_s2] sm:$0xff]  ;;  %vm826_vm2 = vcmask 523264   ;;  %vm1255_vm3 = vcmask 261120   ;;  %s2011_s29 = sshll.u32 %s164_s27, 4  ;;  %s2012_s29 = int_to_ptr.vmem [resolvable:$true] %s2011_s29 }
  0x16   : > { %219 = vperm.xlu1 %2202, %v189_v2   ;;  %229 = vperm.xlu0 %2201, %v191_v3   ;;  %v172_v6 = vld [vmem:[%s169_s9] sm:$0xff]  ;;  %v173_v7 = vld [vmem:[%s169_s9 + $0x8] sm:$0xff]  ;;  %v174_v8 = vld [vmem:[%s169_s9 + $0x10] sm:$0xff]  ;;  %s2207_s7 = scalar_lea.vmem %s2012_s29, 256 }
  0x17   : > { %v236_v9 = vcombine.high %v172_v6, %v172_v6  ;;  %v237_v10 = vcombine.high %v173_v7, %v173_v7  ;;  %v175_v11 = vld [vmem:[%s169_s9 + $0x18] sm:$0xff]  ;;  %v238_v13 = vcombine.high %v174_v8, %v174_v8  ;;  %v2398_v18 = vld [vmem:[%s2958_s1 + $0x10] sm:$0xff]  ;;  %v185_v20 = vld [vmem:[%s2959_s2 + $0x8] sm:$0xff]  ;;  %p2208_p11 = scmp.ne.s32.totalorder %s2012_s29, %s2207_s7  ;;  %s2211_s9 = sshll.u32 %s2272_s8, 4  ;;  %s2212_s9 = int_to_ptr.vmem [resolvable:$false] %s2211_s9 }
  0x18   : > { %v239_v14 = vcombine.high %v175_v11, %v175_v11  ;;  %v179_v21 = vld [vmem:[%s2958_s1 + $0x18] sm:$0xff]  ;;  %v804_v23 = vld [vmem:[%s2959_s2 + $0x50] sm:$0xff]  ;;  %v180_v24 = vld [vmem:[%s2958_s1 + $0x20] sm:$0xff]  ;;  %s2213_s16 = scalar_lea.vmem %s2212_s9, 512  ;;  %p2214_p0 = scmp.lt.s32.totalorder %s2012_s29, %s2212_s9 }
  0x19   : > { %2077 = vmatprep.subr.msk.mxu0 %vm265_vm0, %v236_v9  ;;  %2087 = vmatprep.subr.msk.mxu1 %vm265_vm0, %v237_v10  ;;  %v805_v22 = vld [vmem:[%s2959_s2 + $0x58] sm:$0xff]  ;;  %v803_v25 = vld [vmem:[%s2959_s2 + $0x48] sm:$0xff]  ;;  %v802_v26 = vld [vmem:[%s2959_s2 + $0x40] sm:$0xff]  ;;  %p2209_p12 = pnand %p2208_p11, %p2331_p5  ;;  %p2215_p1 = scmp.lt.s32.totalorder %s2213_s16, %s2207_s7 }
  0x1a   : > { %214 = vperm.xlu1 %2202, %v188_v4   ;;  %224 = vperm.xlu0 %2201, %v190_v5   ;;  %v181_v27 = vld [vmem:[%s2958_s1 + $0x28] sm:$0xff]  ;;  %v1234_v28 = vld [vmem:[%s2959_s2 + $0x78] sm:$0xff]  ;;  %v1233_v29 = vld [vmem:[%s2959_s2 + $0x70] sm:$0xff] }
  0x1b   : > { %2078 = vmatpush1.msk.msra.mxu0 %vm265_vm0, %v172_v6  ;;  %2088 = vmatpush1.msk.msra.mxu1 %vm265_vm0, %v173_v7  ;;  %v182_v30 = vld [vmem:[%s2958_s1 + $0x30] sm:$0xff]  ;;  %v1232_v31 = vld [vmem:[%s2959_s2 + $0x68] sm:$0xff]  ;;  %v1231_v32 = vld [vmem:[%s2959_s2 + $0x60] sm:$0xff]  ;;  %p2210_p13 = pneg %p2209_p12  ;;  %p2216_p2 = por %p2215_p1, %p2214_p0 }
  0x1c   : > { %2079 = vmatmul.mubr.msk.f32.vlgmr.msra.gmra.mxu0 %vm240_vm1, %v2362_v12  ;;  %2089 = vmatmul.mubr.msk.f32.vlgmr.msra.gmra.mxu1 %vm240_vm1, %v2362_v12  ;;  %v183_v33 = vld [vmem:[%s2958_s1 + $0x38] sm:$0xff]  ;;  %v1657_v34 = vld [vmem:[%s2959_s2 + $0x80] sm:$0x3] }
  0x1d   : > { %352 = vmatprep.mubr.f32.mxu0 %v2269_v0  ;;  %465 = vmatprep.mubr.f32.mxu1 %v2269_v0  ;;  %p2217_p3 = pnand %p2216_p2, %p2210_p13 }
  0x1e   : > { %2097 = vmatprep.subr.msk.mxu0 %vm265_vm0, %v238_v13  ;;  %2107 = vmatprep.subr.msk.mxu1 %vm265_vm0, %v239_v14 }
  0x1f   : > { %2098 = vmatpush1.msk.msra.mxu0 %vm265_vm0, %v174_v8  ;;  %2108 = vmatpush1.msk.msra.mxu1 %vm265_vm0, %v175_v11 }
  0x20   : > { %2080 = vmatmul.mubr.msk.f32.gmra.mxu0 %vm240_vm1, %v2377_v15  ;;  %2090 = vmatmul.mubr.msk.f32.gmra.mxu1 %vm240_vm1, %v2377_v15 }
  0x21   : > { %358 = vmatprep.mubr.f32.mxu0 %v2269_v0  ;;  %471 = vmatprep.mubr.f32.mxu1 %v2269_v0 }
  0x22   : > { %204 = vperm.xlu1 %2202, %v186_v16   ;;  %209 = vperm.xlu0 %2201, %v187_v17  }
  0x24   : > { %2081 = vmatmul.mubr.msk.f32.gmra.mxu0 %vm240_vm1, %v2398_v18  ;;  %2091 = vmatmul.mubr.msk.f32.gmra.mxu1 %vm240_vm1, %v2398_v18 }
  0x25   : > { %364 = vmatprep.mubr.f32.mxu0 %v2269_v0  ;;  %477 = vmatprep.mubr.f32.mxu1 %v2269_v0 }
  0x26   : > { %194 = vperm.xlu1 %2202, %v184_v19   ;;  %199 = vperm.xlu0 %2201, %v185_v20  }
  0x28   : > { %2082 = vmatmul.mubr.msk.f32.gmra.mxu0 %vm240_vm1, %v179_v21  ;;  %2092 = vmatmul.mubr.msk.f32.gmra.mxu1 %vm240_vm1, %v179_v21 }
  0x29   : > { %370 = vmatprep.mubr.f32.mxu0 %v2269_v0  ;;  %483 = vmatprep.mubr.f32.mxu1 %v2269_v0 }
  0x2a   : > { %823 = vperm.xlu0 %2201, %v805_v22   ;;  %818 = vperm.xlu1 %2202, %v804_v23  }
  0x2c   : > { %2083 = vmatmul.mubr.msk.f32.gmra.mxu0 %vm240_vm1, %v180_v24  ;;  %2093 = vmatmul.mubr.msk.f32.gmra.mxu1 %vm240_vm1, %v180_v24 }
  0x2d   : > { %376 = vmatprep.mubr.f32.mxu0 %v2269_v0  ;;  %489 = vmatprep.mubr.f32.mxu1 %v2269_v0 }
  0x2e   : > { %813 = vperm.xlu0 %2201, %v803_v25   ;;  %808 = vperm.xlu1 %2202, %v802_v26  }
  0x30   : > { %2084 = vmatmul.mubr.msk.f32.gmra.mxu0 %vm240_vm1, %v181_v27  ;;  %2094 = vmatmul.mubr.msk.f32.gmra.mxu1 %vm240_vm1, %v181_v27 }
  0x31   : > { %382 = vmatprep.mubr.f32.mxu0 %v2269_v0  ;;  %495 = vmatprep.mubr.f32.mxu1 %v2269_v0 }
  0x32   : > { %1252 = vperm.xlu0 %2201, %v1234_v28   ;;  %1247 = vperm.xlu1 %2202, %v1233_v29  }
  0x34   : > { %2085 = vmatmul.mubr.msk.f32.gmra.mxu0 %vm240_vm1, %v182_v30  ;;  %2095 = vmatmul.mubr.msk.f32.gmra.mxu1 %vm240_vm1, %v182_v30 }
  0x35   : > { %388 = vmatprep.mubr.f32.mxu0 %v2269_v0  ;;  %501 = vmatprep.mubr.f32.mxu1 %v2269_v0 }
  0x36   : > { %1242 = vperm.xlu0 %2201, %v1232_v31   ;;  %1237 = vperm.xlu1 %2202, %v1231_v32  }
  0x38   : > { %2086 = vmatmul.mubr.msk.f32.gmra.mxu0 %vm240_vm1, %v183_v33  ;;  %2096 = vmatmul.mubr.msk.f32.gmra.mxu1 %vm240_vm1, %v183_v33 }
  0x39   : > { %572 = vmatprep.mubr.f32.mxu0 %v2269_v0  ;;  %685 = vmatprep.mubr.f32.mxu1 %v2269_v0 }
  0x3a   : > { %1660 = vperm.xlu0 %2201, %v1657_v34  }
  0x3c   : > { %2099 = vmatmul.mubr.msk.f32.vlgmr.msra.gmra.mxu0 %vm240_vm1, %v2362_v12  ;;  %2109 = vmatmul.mubr.msk.f32.vlgmr.msra.gmra.mxu1 %vm240_vm1, %v2362_v12 }
  0x3d   : > { %578 = vmatprep.mubr.f32.mxu0 %v2269_v0  ;;  %691 = vmatprep.mubr.f32.mxu1 %v2269_v0 }
  0x40   : > { %2100 = vmatmul.mubr.msk.f32.gmra.mxu0 %vm240_vm1, %v2377_v15  ;;  %2110 = vmatmul.mubr.msk.f32.gmra.mxu1 %vm240_vm1, %v2377_v15 }
  0x41   : > { %584 = vmatprep.mubr.f32.mxu0 %v2269_v0  ;;  %697 = vmatprep.mubr.f32.mxu1 %v2269_v0 }
  0x44   : > { %2101 = vmatmul.mubr.msk.f32.gmra.mxu0 %vm240_vm1, %v2398_v18  ;;  %2111 = vmatmul.mubr.msk.f32.gmra.mxu1 %vm240_vm1, %v2398_v18 }
  0x45   : > { %590 = vmatprep.mubr.f32.mxu0 %v2269_v0  ;;  %703 = vmatprep.mubr.f32.mxu1 %v2269_v0 }
  0x48   : > { %2102 = vmatmul.mubr.msk.f32.gmra.mxu0 %vm240_vm1, %v179_v21  ;;  %2112 = vmatmul.mubr.msk.f32.gmra.mxu1 %vm240_vm1, %v179_v21 }
  0x49   : > { %596 = vmatprep.mubr.f32.mxu0 %v2269_v0  ;;  %709 = vmatprep.mubr.f32.mxu1 %v2269_v0 }
  0x4c   : > { %2103 = vmatmul.mubr.msk.f32.gmra.mxu0 %vm240_vm1, %v180_v24  ;;  %2113 = vmatmul.mubr.msk.f32.gmra.mxu1 %vm240_vm1, %v180_v24 }
  0x4d   : > { %602 = vmatprep.mubr.f32.mxu0 %v2269_v0  ;;  %715 = vmatprep.mubr.f32.mxu1 %v2269_v0 }
  0x50   : > { %2104 = vmatmul.mubr.msk.f32.gmra.mxu0 %vm240_vm1, %v181_v27  ;;  %2114 = vmatmul.mubr.msk.f32.gmra.mxu1 %vm240_vm1, %v181_v27 }
  0x51   : > { %608 = vmatprep.mubr.f32.mxu0 %v2269_v0  ;;  %721 = vmatprep.mubr.f32.mxu1 %v2269_v0 }
  0x54   : > { %2105 = vmatmul.mubr.msk.f32.gmra.mxu0 %vm240_vm1, %v182_v30  ;;  %2115 = vmatmul.mubr.msk.f32.gmra.mxu1 %vm240_vm1, %v182_v30 }
  0x55   : > { %614 = vmatprep.mubr.f32.mxu0 %v2269_v0  ;;  %727 = vmatprep.mubr.f32.mxu1 %v2269_v0 }
  0x58   : > { %2106 = vmatmul.mubr.msk.f32.gmra.mxu0 %vm240_vm1, %v183_v33  ;;  %2116 = vmatmul.mubr.msk.f32.gmra.mxu1 %vm240_vm1, %v183_v33 }
  0x59   : > { %903 = vmatprep.mubr.f32.mxu0 %v2269_v0  ;;  %992 = vmatprep.mubr.f32.mxu1 %v2269_v0 }
  0x91   : > { %v2540_v57 = vpop.permute.xlu0 %229  ;;  %v2542_v60 = vpop.permute.xlu1 %219 }
  0x95   : > { %v2544_v2 = vpop.permute.xlu0 %224  ;;  %v2546_v5 = vpop.permute.xlu1 %214 }
  0x9d   : > { %v2560_v18 = vpop.permute.xlu0 %209  ;;  %v2570_v29 = vpop.permute.xlu1 %204 }
  0xdc   : > { %v2512_v35 = vpop.f32.mrf.mxu0  ;;  %v2514_v36 = vpop.f32.mrf.mxu1 }
  0xde   : > { %v2516_v37 = vpop.f32.mrf.mxu0  ;;  %v2518_v38 = vpop.f32.mrf.mxu1 }
  0xe0   : > { %v2520_v39 = vpop.f32.mrf.mxu0  ;;  %v2522_v40 = vpop.f32.mrf.mxu1 }
  0xe2   : > { %v2524_v41 = vpop.f32.mrf.mxu0  ;;  %v2526_v42 = vpop.f32.mrf.mxu1 }
  0xe4   : > { %v2528_v43 = vpop.f32.mrf.mxu0  ;;  %v2530_v44 = vpop.f32.mrf.mxu1 }
  0xe6   : > { %v2532_v45 = vpop.f32.mrf.mxu0  ;;  %v2534_v46 = vpop.f32.mrf.mxu1 }
  0xe8   : > { %v2536_v47 = vpop.f32.mrf.mxu0  ;;  %v2538_v48 = vpop.f32.mrf.mxu1 }
  0xea   : > { %v368_v49 = vpop.f32.mrf.mxu0  ;;  %v481_v50 = vpop.f32.mrf.mxu1 }
  0xec   : > { %v372_v51 = vpop.f32.mrf.mxu0  ;;  %v485_v52 = vpop.f32.mrf.mxu1 }
  0xed   : > { %v373_v34 = vadd.f32 %v372_v51, %v2546_v5  ;;  %v367_v51 = vadd.f32 %v2536_v47, %v2560_v18 }
  0xee   : > { %v374_v53 = vpop.f32.mrf.mxu0  ;;  %v487_v54 = vpop.f32.mrf.mxu1 }
  0xef   : > { %v375_v30 = vadd.f32 %v374_v53, %v2546_v5  ;;  %v488_v31 = vadd.f32 %v487_v54, %v2546_v5  ;;  %v369_v53 = vadd.f32 %v368_v49, %v2560_v18  ;;  %v482_v54 = vadd.f32 %v481_v50, %v2560_v18  ;;  %v2590_v49 = vpop.permute.xlu0 %199 }
  0xf0   : > { %v378_v55 = vpop.f32.mrf.mxu0  ;;  %v491_v56 = vpop.f32.mrf.mxu1  ;;  %v363_v50 = vadd.f32 %v2532_v45, %v2570_v29 }
  0xf1   : > { %v379_v23 = vadd.f32 %v378_v55, %v2542_v60  ;;  %v492_v24 = vadd.f32 %v491_v56, %v2542_v60  ;;  %v486_v55 = vadd.f32 %v485_v52, %v2546_v5  ;;  %v480_v52 = vadd.f32 %v2538_v48, %v2560_v18  ;;  %v2604_v45 = vpop.permute.xlu1 %194 }
  0xf2   : > { %v380_v58 = vpop.f32.mrf.mxu0  ;;  %v493_v59 = vpop.f32.mrf.mxu1  ;;  %v767_v47 = vmax.f32 %v375_v30, 0.0  ;;  %v361_v48 = vadd.f32 %v2528_v43, %v2570_v29  ;;  %v759_v43 = vmax.f32 %v369_v53, 0.0 }
  0xf3   : > { %v381_v19 = vadd.f32 %v380_v58, %v2542_v60  ;;  %v494_v20 = vadd.f32 %v493_v59, %v2542_v60 }
  0xf4   : > { %v384_v61 = vpop.f32.mrf.mxu0  ;;  %v497_v62 = vpop.f32.mrf.mxu1 }
  0xf5   : > { %v385_v14 = vadd.f32 %v384_v61, %v2544_v2  ;;  %v498_v15 = vadd.f32 %v497_v62, %v2544_v2  ;;  %v775_v62 = vmax.f32 %v381_v19, 0.0  ;;  %v468_v19 = vadd.f32 %v2522_v40, %v2590_v49 }
  0xf6   : > { %v386_v63 = vpop.f32.mrf.mxu0  ;;  %v499_v1 = vpop.f32.mrf.mxu1  ;;  %v462_v40 = vadd.f32 %v2514_v36, %v2604_v45 }
  0xf7   : > { %v387_v10 = vadd.f32 %v386_v63, %v2544_v2  ;;  %v500_v11 = vadd.f32 %v499_v1, %v2544_v2  ;;  %v782_v56 = vmax.f32 %v385_v14, 0.0  ;;  %v784_v58 = vmax.f32 %v498_v15, 0.0 }
  0xf8   : > { %v390_v3 = vpop.f32.mrf.mxu0  ;;  %v503_v4 = vpop.f32.mrf.mxu1  ;;  %v777_v63 = vmax.f32 %v494_v20, 0.0  ;;  %v774_v1 = vmax.f32 %v379_v23, 0.0  ;;  %v470_v14 = vadd.f32 %v2526_v42, %v2590_v49  ;;  %v761_v15 = vmax.f32 %v482_v54, 0.0 }
  0xf9   : > { %v391_v6 = vadd.f32 %v390_v3, %v2540_v57  ;;  %v504_v7 = vadd.f32 %v503_v4, %v2540_v57  ;;  %v783_v32 = vmax.f32 %v387_v10, 0.0  ;;  %v785_v33 = vmax.f32 %v500_v11, 0.0 }
  0xfa   : > { %v392_v8 = vpop.f32.mrf.mxu0  ;;  %v505_v9 = vpop.f32.mrf.mxu1  ;;  %v776_v3 = vmax.f32 %v492_v24, 0.0  ;;  %v766_v10 = vmax.f32 %v373_v34, 0.0  ;;  %v768_v11 = vmax.f32 %v486_v55, 0.0  ;;  %v758_v20 = vmax.f32 %v367_v51, 0.0 }
  0xfb   : > { %v393_v12 = vadd.f32 %v392_v8, %v2540_v57  ;;  %v506_v13 = vadd.f32 %v505_v9, %v2540_v57  ;;  %v790_v25 = vmax.f32 %v391_v6, 0.0  ;;  %v792_v26 = vmax.f32 %v504_v7, 0.0 }
  0xfc   : > { %v2556_v16 = vpop.f32.mrf.mxu0  ;;  %v2558_v17 = vpop.f32.mrf.mxu1  ;;  %v476_v7 = vadd.f32 %v2534_v46, %v2570_v29  ;;  %v769_v8 = vmax.f32 %v488_v31, 0.0  ;;  %v474_v9 = vadd.f32 %v2530_v44, %v2570_v29  ;;  %v357_v46 = vadd.f32 %v2524_v41, %v2590_v49 }
  0xfd   : > { %v791_v21 = vmax.f32 %v393_v12, 0.0  ;;  %v793_v22 = vmax.f32 %v506_v13, 0.0  ;;  %v355_v44 = vadd.f32 %v2520_v39, %v2590_v49  ;;  %v351_v41 = vadd.f32 %v2516_v37, %v2604_v45 }
  0xfe   : > { %v2566_v27 = vpop.f32.mrf.mxu0  ;;  %v2568_v28 = vpop.f32.mrf.mxu1  ;;  %v464_v42 = vadd.f32 %v2518_v38, %v2604_v45  ;;  %v751_v24 = vmax.f32 %v363_v50, 0.0  ;;  %v349_v39 = vadd.f32 %v2512_v35, %v2604_v45  ;;  %v752_v30 = vmax.f32 %v474_v9, 0.0  ;;  %v2652_v50 = vld [vmem:[%s2958_s1 + $0x48] sm:$0xff]  ;;  %v2663_v9 = vld [vmem:[%s2958_s1 + $0x50] sm:$0xff] }
  0xff   : > { %855 = vmatprep.subr.mxu0 %v791_v21  ;;  %944 = vmatprep.subr.mxu1 %v793_v22  ;;  %v760_v21 = vmax.f32 %v480_v52, 0.0  ;;  %v743_v37 = vmax.f32 %v357_v46, 0.0  ;;  %v745_v38 = vmax.f32 %v470_v14, 0.0  ;;  %v744_v34 = vmax.f32 %v468_v19, 0.0 }
 0x100   : > { %v2576_v59 = vpop.f32.mrf.mxu0  ;;  %v2578_v61 = vpop.f32.mrf.mxu1  ;;  %856 = vmatpush1.msra.mxu0 %v790_v25  ;;  %945 = vmatpush1.msra.mxu1 %v792_v26  ;;  %v753_v25 = vmax.f32 %v476_v7, 0.0  ;;  %v750_v26 = vmax.f32 %v361_v48, 0.0  ;;  %v735_v36 = vmax.f32 %v351_v41, 0.0  ;;  %v736_v53 = vmax.f32 %v462_v40, 0.0 }
 0x101   : > { %857 = vmatprep.subr.mxu0 %v783_v32  ;;  %946 = vmatprep.subr.mxu1 %v785_v33  ;;  %v742_v33 = vmax.f32 %v355_v44, 0.0 }
 0x102   : > { %v2586_v4 = vpop.f32.mrf.mxu0  ;;  %v2588_v6 = vpop.f32.mrf.mxu1  ;;  %858 = vmatpush1.msra.mxu0 %v782_v56  ;;  %947 = vmatpush1.msra.mxu1 %v784_v58  ;;  %v737_v56 = vmax.f32 %v464_v42, 0.0  ;;  %v734_v58 = vmax.f32 %v349_v39, 0.0 }
 0x103   : > { %859 = vmatprep.subr.mxu0 %v775_v62  ;;  %948 = vmatprep.subr.mxu1 %v777_v63  ;;  %v2641_v63 = vld [vmem:[%s2958_s1 + $0x40] sm:$0xff] }
 0x104   : > { %v2600_v12 = vpop.f32.mrf.mxu0  ;;  %v2602_v13 = vpop.f32.mrf.mxu1  ;;  %860 = vmatpush1.msra.mxu0 %v774_v1  ;;  %949 = vmatpush1.msra.mxu1 %v776_v3 }
 0x105   : > { %861 = vmatprep.subr.mxu0 %v767_v47  ;;  %950 = vmatprep.subr.mxu1 %v769_v8 }
 0x106   : > { %v2614_v22 = vpop.f32.mrf.mxu0  ;;  %v2616_v23 = vpop.f32.mrf.mxu1  ;;  %862 = vmatpush1.msra.mxu0 %v766_v10  ;;  %951 = vmatpush1.msra.mxu1 %v768_v11 }
 0x107   : > { %863 = vmatprep.subr.mxu0 %v759_v43  ;;  %952 = vmatprep.subr.mxu1 %v761_v15  ;;  %v2674_v43 = vld [vmem:[%s2958_s1 + $0x58] sm:$0xff] }
 0x108   : > { %v2626_v31 = vpop.f32.mrf.mxu0  ;;  %v2628_v32 = vpop.f32.mrf.mxu1  ;;  %864 = vmatpush1.msra.mxu0 %v758_v20  ;;  %953 = vmatpush1.msra.mxu1 %v760_v21 }
 0x109   : > { %865 = vmatprep.subr.mxu0 %v751_v24  ;;  %954 = vmatprep.subr.mxu1 %v753_v25 }
 0x10a   : > { %v2630_v55 = vpop.f32.mrf.mxu0  ;;  %v2632_v35 = vpop.f32.mrf.mxu1  ;;  %866 = vmatpush1.msra.mxu0 %v750_v26  ;;  %955 = vmatpush1.msra.mxu1 %v752_v30 }
 0x10b   : > { %867 = vmatprep.subr.mxu0 %v743_v37  ;;  %956 = vmatprep.subr.mxu1 %v745_v38 }
 0x10c   : > { %v2634_v54 = vpop.f32.mrf.mxu0  ;;  %v2636_v62 = vpop.f32.mrf.mxu1  ;;  %868 = vmatpush1.msra.mxu0 %v742_v33  ;;  %957 = vmatpush1.msra.mxu1 %v744_v34 }
 0x10d   : > { %869 = vmatprep.subr.mxu0 %v735_v36  ;;  %958 = vmatprep.subr.mxu1 %v737_v56 }
 0x10e   : > { %v600_v51 = vpop.f32.mrf.mxu0  ;;  %v713_v52 = vpop.f32.mrf.mxu1  ;;  %870 = vmatpush1.msra.mxu0 %v734_v58  ;;  %959 = vmatpush1.msra.mxu1 %v736_v53  ;;  %v599_v53 = vadd.f32 %v2634_v54, %v2546_v5  ;;  %v593_v54 = vadd.f32 %v2626_v31, %v2560_v18  ;;  %v587_v31 = vadd.f32 %v2600_v12, %v2570_v29 }
 0x10f   : > { %2117 = vmatmul.mubr.msk.f32.vlgmr.msra.gmra.mxu0 %vm826_vm2, %v2641_v63  ;;  %2121 = vmatmul.mubr.msk.f32.vlgmr.msra.gmra.mxu1 %vm826_vm2, %v2641_v63  ;;  %v601_v36 = vadd.f32 %v600_v51, %v2546_v5  ;;  %v708_v51 = vadd.f32 %v2632_v35, %v2560_v18  ;;  %v702_v35 = vadd.f32 %v2616_v23, %v2570_v29 }
 0x110   : > { %v604_v1 = vpop.f32.mrf.mxu0  ;;  %v717_v3 = vpop.f32.mrf.mxu1  ;;  %909 = vmatprep.mubr.f32.mxu0 %v2269_v0  ;;  %998 = vmatprep.mubr.f32.mxu1 %v2269_v0  ;;  %v696_v23 = vadd.f32 %v2588_v6, %v2590_v49  ;;  %v581_v12 = vadd.f32 %v2576_v59, %v2590_v49  ;;  %v690_v6 = vadd.f32 %v2568_v28, %v2604_v45 }
 0x111   : > { %v605_v37 = vadd.f32 %v604_v1, %v2542_v60  ;;  %v718_v38 = vadd.f32 %v717_v3, %v2542_v60  ;;  %v575_v59 = vadd.f32 %v2556_v16, %v2604_v45 }
 0x112   : > { %v606_v7 = vpop.f32.mrf.mxu0  ;;  %v719_v47 = vpop.f32.mrf.mxu1 }
 0x113   : > { %2118 = vmatmul.mubr.msk.f32.gmra.mxu0 %vm826_vm2, %v2652_v50  ;;  %2122 = vmatmul.mubr.msk.f32.gmra.mxu1 %vm826_vm2, %v2652_v50  ;;  %v607_v40 = vadd.f32 %v606_v7, %v2542_v60  ;;  %v720_v26 = vadd.f32 %v719_v47, %v2542_v60  ;;  %v712_v7 = vadd.f32 %v2636_v62, %v2546_v5  ;;  %v778_v62 = vmax.f32 %v605_v37, 0.0  ;;  %v2756_v37 = vpop.permute.xlu0 %823 }
 0x114   : > { %v610_v8 = vpop.f32.mrf.mxu0  ;;  %v723_v48 = vpop.f32.mrf.mxu1  ;;  %915 = vmatprep.mubr.f32.mxu0 %v2269_v0  ;;  %1004 = vmatprep.mubr.f32.mxu1 %v2269_v0  ;;  %v595_v60 = vadd.f32 %v2630_v55, %v2560_v18  ;;  %v589_v55 = vadd.f32 %v2614_v22, %v2570_v29  ;;  %v583_v22 = vadd.f32 %v2586_v4, %v2590_v49  ;;  %v738_v16 = vmax.f32 %v575_v59, 0.0 }
 0x115   : > { %v611_v25 = vadd.f32 %v610_v8, %v2544_v2  ;;  %v724_v39 = vadd.f32 %v723_v48, %v2544_v2  ;;  %v781_v3 = vmax.f32 %v720_v26, 0.0  ;;  %v780_v8 = vmax.f32 %v718_v38, 0.0 }
 0x116   : > { %v612_v10 = vpop.f32.mrf.mxu0  ;;  %v725_v11 = vpop.f32.mrf.mxu1  ;;  %v771_v48 = vmax.f32 %v601_v36, 0.0  ;;  %v577_v4 = vadd.f32 %v2566_v27, %v2604_v45  ;;  %v746_v27 = vmax.f32 %v581_v12, 0.0 }
 0x117   : > { %2119 = vmatmul.mubr.msk.f32.gmra.mxu0 %vm826_vm2, %v2663_v9  ;;  %2123 = vmatmul.mubr.msk.f32.gmra.mxu1 %vm826_vm2, %v2663_v9  ;;  %v613_v15 = vadd.f32 %v612_v10, %v2544_v2  ;;  %v726_v41 = vadd.f32 %v725_v11, %v2544_v2  ;;  %v714_v2 = vadd.f32 %v713_v52, %v2546_v5  ;;  %v786_v47 = vmax.f32 %v611_v25, 0.0 }
 0x118   : > { %v616_v46 = vpop.f32.mrf.mxu0  ;;  %v729_v14 = vpop.f32.mrf.mxu1  ;;  %921 = vmatprep.mubr.f32.mxu0 %v2269_v0  ;;  %1010 = vmatprep.mubr.f32.mxu1 %v2269_v0  ;;  %v788_v1 = vmax.f32 %v724_v39, 0.0  ;;  %v779_v52 = vmax.f32 %v607_v40, 0.0  ;;  %v706_v5 = vadd.f32 %v2628_v32, %v2560_v18  ;;  %v700_v18 = vadd.f32 %v2602_v13, %v2570_v29 }
 0x119   : > { %v617_v44 = vadd.f32 %v616_v46, %v2540_v57  ;;  %v730_v19 = vadd.f32 %v729_v14, %v2540_v57  ;;  %v787_v56 = vmax.f32 %v613_v15, 0.0  ;;  %v789_v58 = vmax.f32 %v726_v41, 0.0 }
 0x11a   : > { %v618_v20 = vpop.f32.mrf.mxu0  ;;  %v731_v21 = vpop.f32.mrf.mxu1  ;;  %v773_v10 = vmax.f32 %v714_v2, 0.0  ;;  %v770_v32 = vmax.f32 %v599_v53, 0.0  ;;  %v772_v11 = vmax.f32 %v712_v7, 0.0  ;;  %v763_v46 = vmax.f32 %v595_v60, 0.0 }
 0x11b   : > { %v619_v42 = vadd.f32 %v618_v20, %v2540_v57  ;;  %v732_v24 = vadd.f32 %v731_v21, %v2540_v57  ;;  %2120 = vmatmul.mubr.msk.f32.gmra.mxu0 %vm826_vm2, %v2674_v43  ;;  %2124 = vmatmul.mubr.msk.f32.gmra.mxu1 %vm826_vm2, %v2674_v43  ;;  %v794_v33 = vmax.f32 %v617_v44, 0.0  ;;  %v796_v34 = vmax.f32 %v730_v19, 0.0 }
 0x11c   : > { %1081 = vmatprep.mubr.f32.mxu0 %v2269_v0  ;;  %1170 = vmatprep.mubr.f32.mxu1 %v2269_v0  ;;  %v765_v14 = vmax.f32 %v708_v51, 0.0  ;;  %v694_v29 = vadd.f32 %v2578_v61, %v2590_v49  ;;  %v762_v13 = vmax.f32 %v593_v54, 0.0  ;;  %v764_v15 = vmax.f32 %v706_v5, 0.0  ;;  %v2766_v51 = vpop.permute.xlu0 %813 }
 0x11d   : > { %v795_v30 = vmax.f32 %v619_v42, 0.0  ;;  %v797_v57 = vmax.f32 %v732_v24, 0.0  ;;  %v755_v44 = vmax.f32 %v589_v55, 0.0  ;;  %v757_v19 = vmax.f32 %v702_v35, 0.0 }
 0x11e   : > { %v688_v61 = vadd.f32 %v2558_v17, %v2604_v45  ;;  %v754_v49 = vmax.f32 %v587_v31, 0.0  ;;  %v756_v20 = vmax.f32 %v700_v18, 0.0  ;;  %v747_v21 = vmax.f32 %v583_v22, 0.0 }
 0x11f   : > { %1033 = vmatprep.subr.mxu0 %v795_v30  ;;  %1122 = vmatprep.subr.mxu1 %v797_v57  ;;  %v749_v41 = vmax.f32 %v696_v23, 0.0  ;;  %v748_v28 = vmax.f32 %v694_v29, 0.0  ;;  %v739_v42 = vmax.f32 %v577_v4, 0.0  ;;  %v741_v24 = vmax.f32 %v690_v6, 0.0 }
 0x120   : > { %1034 = vmatpush1.msra.mxu0 %v794_v33  ;;  %1123 = vmatpush1.msra.mxu1 %v796_v34  ;;  %v740_v25 = vmax.f32 %v688_v61, 0.0  ;;  %v2758_v34 = vpop.permute.xlu1 %818  ;;  %v2783_v61 = vld [vmem:[%s2958_s1 + $0x60] sm:$0xff] }
 0x121   : > { %1035 = vmatprep.subr.mxu0 %v787_v56  ;;  %1124 = vmatprep.subr.mxu1 %v789_v58 }
 0x122   : > { %1036 = vmatpush1.msra.mxu0 %v786_v47  ;;  %1125 = vmatpush1.msra.mxu1 %v788_v1 }
 0x123   : > { %1037 = vmatprep.subr.mxu0 %v779_v52  ;;  %1126 = vmatprep.subr.mxu1 %v781_v3 }
 0x124   : > { %1038 = vmatpush1.msra.mxu0 %v778_v62  ;;  %1127 = vmatpush1.msra.mxu1 %v780_v8  ;;  %v2772_v55 = vpop.permute.xlu1 %808 }
 0x125   : > { %1039 = vmatprep.subr.mxu0 %v771_v48  ;;  %1128 = vmatprep.subr.mxu1 %v773_v10 }
 0x126   : > { %1040 = vmatpush1.msra.mxu0 %v770_v32  ;;  %1129 = vmatpush1.msra.mxu1 %v772_v11 }
 0x127   : > { %1041 = vmatprep.subr.mxu0 %v763_v46  ;;  %1130 = vmatprep.subr.mxu1 %v765_v14 }
 0x128   : > { %1042 = vmatpush1.msra.mxu0 %v762_v13  ;;  %1131 = vmatpush1.msra.mxu1 %v764_v15 }
 0x129   : > { %1043 = vmatprep.subr.mxu0 %v755_v44  ;;  %1132 = vmatprep.subr.mxu1 %v757_v19 }
 0x12a   : > { %1044 = vmatpush1.msra.mxu0 %v754_v49  ;;  %1133 = vmatpush1.msra.mxu1 %v756_v20  ;;  %v2794_v49 = vld [vmem:[%s2958_s1 + $0x68] sm:$0xff] }
 0x12b   : > { %1045 = vmatprep.subr.mxu0 %v747_v21  ;;  %1134 = vmatprep.subr.mxu1 %v749_v41  ;;  %v2805_v41 = vld [vmem:[%s2958_s1 + $0x70] sm:$0xff] }
 0x12c   : > { %1046 = vmatpush1.msra.mxu0 %v746_v27  ;;  %1135 = vmatpush1.msra.mxu1 %v748_v28 }
 0x12d   : > { %1047 = vmatprep.subr.mxu0 %v739_v42  ;;  %1136 = vmatprep.subr.mxu1 %v741_v24 }
 0x12e   : > { %1048 = vmatpush1.msra.mxu0 %v738_v16  ;;  %1137 = vmatpush1.msra.mxu1 %v740_v25  ;;  %v2816_v16 = vld [vmem:[%s2958_s1 + $0x78] sm:$0xff] }
 0x12f   : > { %2125 = vmatmul.mubr.msk.f32.vlgmr.msra.gmra.mxu0 %vm826_vm2, %v2641_v63  ;;  %2129 = vmatmul.mubr.msk.f32.vlgmr.msra.gmra.mxu1 %vm826_vm2, %v2641_v63 }
 0x130   : > { %1087 = vmatprep.mubr.f32.mxu0 %v2269_v0  ;;  %1176 = vmatprep.mubr.f32.mxu1 %v2269_v0 }
 0x133   : > { %2126 = vmatmul.mubr.msk.f32.gmra.mxu0 %vm826_vm2, %v2652_v50  ;;  %2130 = vmatmul.mubr.msk.f32.gmra.mxu1 %vm826_vm2, %v2652_v50 }
 0x134   : > { %1093 = vmatprep.mubr.f32.mxu0 %v2269_v0  ;;  %1182 = vmatprep.mubr.f32.mxu1 %v2269_v0 }
 0x137   : > { %2127 = vmatmul.mubr.msk.f32.gmra.mxu0 %vm826_vm2, %v2663_v9  ;;  %2131 = vmatmul.mubr.msk.f32.gmra.mxu1 %vm826_vm2, %v2663_v9 }
 0x138   : > { %1099 = vmatprep.mubr.f32.mxu0 %v2269_v0  ;;  %1188 = vmatprep.mubr.f32.mxu1 %v2269_v0 }
 0x13b   : > { %2128 = vmatmul.mubr.msk.f32.gmra.mxu0 %vm826_vm2, %v2674_v43  ;;  %2132 = vmatmul.mubr.msk.f32.gmra.mxu1 %vm826_vm2, %v2674_v43 }
 0x13c   : > { %1332 = vmatprep.mubr.f32.mxu0 %v2269_v0  ;;  %1421 = vmatprep.mubr.f32.mxu1 %v2269_v0 }
 0x1cf   : > { %v905_v17 = vpop.f32.mrf.mxu0  ;;  %v994_v45 = vpop.f32.mrf.mxu1 }
 0x1d0   : > { %v906_v23 = vadd.f32 %v905_v17, %v2772_v55  ;;  %v995_v46 = vadd.f32 %v994_v45, %v2772_v55 }
 0x1d1   : > { %v907_v63 = vpop.f32.mrf.mxu0  ;;  %v996_v50 = vpop.f32.mrf.mxu1 }
 0x1d2   : > { %v908_v18 = vadd.f32 %v907_v63, %v2772_v55  ;;  %v997_v32 = vadd.f32 %v996_v50, %v2772_v55  ;;  %v1195_v19 = vmax.f32 %v906_v23, 0.0  ;;  %v1197_v59 = vmax.f32 %v995_v46, 0.0 }
 0x1d3   : > { %v911_v39 = vpop.f32.mrf.mxu0  ;;  %v1000_v9 = vpop.f32.mrf.mxu1 }
 0x1d4   : > { %v912_v35 = vadd.f32 %v911_v39, %v2766_v51  ;;  %v1001_v48 = vadd.f32 %v1000_v9, %v2766_v51  ;;  %v1196_v6 = vmax.f32 %v908_v18, 0.0  ;;  %v1198_v44 = vmax.f32 %v997_v32, 0.0 }
 0x1d5   : > { %v913_v40 = vpop.f32.mrf.mxu0  ;;  %v1002_v26 = vpop.f32.mrf.mxu1 }
 0x1d6   : > { %v914_v54 = vadd.f32 %v913_v40, %v2766_v51  ;;  %v1003_v5 = vadd.f32 %v1002_v26, %v2766_v51  ;;  %v1203_v15 = vmax.f32 %v912_v35, 0.0  ;;  %v1205_v4 = vmax.f32 %v1001_v48, 0.0 }
 0x1d7   : > { %v917_v30 = vpop.f32.mrf.mxu0  ;;  %v1006_v57 = vpop.f32.mrf.mxu1 }
 0x1d8   : > { %v918_v52 = vadd.f32 %v917_v30, %v2758_v34  ;;  %v1007_v3 = vadd.f32 %v1006_v57, %v2758_v34  ;;  %v1204_v29 = vmax.f32 %v914_v54, 0.0  ;;  %v1206_v13 = vmax.f32 %v1003_v5, 0.0 }
 0x1d9   : > { %v919_v38 = vpop.f32.mrf.mxu0  ;;  %v1008_v33 = vpop.f32.mrf.mxu1 }
 0x1da   : > { %v920_v7 = vadd.f32 %v919_v38, %v2758_v34  ;;  %v1009_v47 = vadd.f32 %v1008_v33, %v2758_v34  ;;  %v1211_v14 = vmax.f32 %v918_v52, 0.0  ;;  %v1213_v12 = vmax.f32 %v1007_v3, 0.0 }
 0x1db   : > { %v923_v43 = vpop.f32.mrf.mxu0  ;;  %v1012_v36 = vpop.f32.mrf.mxu1 }
 0x1dc   : > { %v924_v2 = vadd.f32 %v923_v43, %v2756_v37  ;;  %v1013_v56 = vadd.f32 %v1012_v36, %v2756_v37  ;;  %v1212_v11 = vmax.f32 %v920_v7, 0.0  ;;  %v1214_v22 = vmax.f32 %v1009_v47, 0.0 }
 0x1dd   : > { %v925_v58 = vpop.f32.mrf.mxu0  ;;  %v1014_v53 = vpop.f32.mrf.mxu1 }
 0x1de   : > { %v926_v1 = vadd.f32 %v925_v58, %v2756_v37  ;;  %v1015_v60 = vadd.f32 %v1014_v53, %v2756_v37  ;;  %v1219_v10 = vmax.f32 %v924_v2, 0.0  ;;  %v1221_v31 = vmax.f32 %v1013_v56, 0.0 }
 0x1e0   : > { %v1220_v62 = vmax.f32 %v926_v1, 0.0  ;;  %v1222_v8 = vmax.f32 %v1015_v60, 0.0 }
 0x1e2   : > { %1292 = vmatprep.subr.mxu0 %v1220_v62  ;;  %1381 = vmatprep.subr.mxu1 %v1222_v8 }
 0x1e3   : > { %1293 = vmatpush1.msra.mxu0 %v1219_v10  ;;  %1382 = vmatpush1.msra.mxu1 %v1221_v31 }
 0x1e4   : > { %1294 = vmatprep.subr.mxu0 %v1212_v11  ;;  %1383 = vmatprep.subr.mxu1 %v1214_v22 }
 0x1e5   : > { %1295 = vmatpush1.msra.mxu0 %v1211_v14  ;;  %1384 = vmatpush1.msra.mxu1 %v1213_v12 }
 0x1e6   : > { %1296 = vmatprep.subr.mxu0 %v1204_v29  ;;  %1385 = vmatprep.subr.mxu1 %v1206_v13 }
 0x1e7   : > { %1297 = vmatpush1.msra.mxu0 %v1203_v15  ;;  %1386 = vmatpush1.msra.mxu1 %v1205_v4 }
 0x1e8   : > { %1298 = vmatprep.subr.mxu0 %v1196_v6  ;;  %1387 = vmatprep.subr.mxu1 %v1198_v44 }
 0x1e9   : > { %1299 = vmatpush1.msra.mxu0 %v1195_v19  ;;  %1388 = vmatpush1.msra.mxu1 %v1197_v59  ;;  %v2864_v59 = vpop.permute.xlu0 %1252 }
 0x1ea   : > { %2133 = vmatmul.mubr.msk.f32.vlgmr.msra.gmra.mxu0 %vm1255_vm3, %v2783_v61  ;;  %2137 = vmatmul.mubr.msk.f32.vlgmr.msra.gmra.mxu1 %vm1255_vm3, %v2783_v61 }
 0x1eb   : > { %1338 = vmatprep.mubr.f32.mxu0 %v2269_v0  ;;  %1427 = vmatprep.mubr.f32.mxu1 %v2269_v0 }
 0x1ee   : > { %2134 = vmatmul.mubr.msk.f32.gmra.mxu0 %vm1255_vm3, %v2794_v49  ;;  %2138 = vmatmul.mubr.msk.f32.gmra.mxu1 %vm1255_vm3, %v2794_v49 }
 0x1ef   : > { %v1083_v20 = vpop.f32.mrf.mxu0  ;;  %v1172_v21 = vpop.f32.mrf.mxu1  ;;  %1344 = vmatprep.mubr.f32.mxu0 %v2269_v0  ;;  %1433 = vmatprep.mubr.f32.mxu1 %v2269_v0 }
 0x1f0   : > { %v1173_v35 = vadd.f32 %v1172_v21, %v2772_v55 }
 0x1f1   : > { %v1085_v27 = vpop.f32.mrf.mxu0  ;;  %v1174_v28 = vpop.f32.mrf.mxu1 }
 0x1f2   : > { %2135 = vmatmul.mubr.msk.f32.gmra.mxu0 %vm1255_vm3, %v2805_v41  ;;  %2139 = vmatmul.mubr.msk.f32.gmra.mxu1 %vm1255_vm3, %v2805_v41  ;;  %v1086_v5 = vadd.f32 %v1085_v27, %v2772_v55  ;;  %v1201_v46 = vmax.f32 %v1173_v35, 0.0  ;;  %v2891_v35 = vld [vmem:[%s2958_s1 + $0x80] sm:$0x3] }
 0x1f3   : > { %v1089_v42 = vpop.f32.mrf.mxu0  ;;  %v1178_v24 = vpop.f32.mrf.mxu1  ;;  %1350 = vmatprep.mubr.f32.mxu0 %v2269_v0  ;;  %1439 = vmatprep.mubr.f32.mxu1 %v2269_v0 }
 0x1f4   : > { %v1090_v60 = vadd.f32 %v1089_v42, %v2766_v51  ;;  %v1179_v52 = vadd.f32 %v1178_v24, %v2766_v51  ;;  %v1200_v11 = vmax.f32 %v1086_v5, 0.0 }
 0x1f5   : > { %v1091_v25 = vpop.f32.mrf.mxu0  ;;  %v1180_v17 = vpop.f32.mrf.mxu1 }
 0x1f6   : > { %2136 = vmatmul.mubr.msk.f32.gmra.mxu0 %vm1255_vm3, %v2816_v16  ;;  %2140 = vmatmul.mubr.msk.f32.gmra.mxu1 %vm1255_vm3, %v2816_v16  ;;  %v1092_v53 = vadd.f32 %v1091_v25, %v2766_v51  ;;  %v1181_v7 = vadd.f32 %v1180_v17, %v2766_v51  ;;  %v1207_v18 = vmax.f32 %v1090_v60, 0.0  ;;  %v1209_v32 = vmax.f32 %v1179_v52, 0.0 }
 0x1f7   : > { %v1095_v45 = vpop.f32.mrf.mxu0  ;;  %v1184_v63 = vpop.f32.mrf.mxu1  ;;  %1510 = vmatprep.mubr.f32.mxu0 %v2269_v0  ;;  %1599 = vmatprep.mubr.f32.mxu1 %v2269_v0 }
 0x1f8   : > { %v1096_v56 = vadd.f32 %v1095_v45, %v2758_v34  ;;  %v1185_v58 = vadd.f32 %v1184_v63, %v2758_v34  ;;  %v1208_v31 = vmax.f32 %v1092_v53, 0.0  ;;  %v1210_v51 = vmax.f32 %v1181_v7, 0.0  ;;  %v2874_v63 = vpop.permute.xlu0 %1242 }
 0x1f9   : > { %v1097_v50 = vpop.f32.mrf.mxu0  ;;  %v1186_v39 = vpop.f32.mrf.mxu1 }
 0x1fa   : > { %v1098_v33 = vadd.f32 %v1097_v50, %v2758_v34  ;;  %v1187_v43 = vadd.f32 %v1186_v39, %v2758_v34  ;;  %v1084_v34 = vadd.f32 %v1083_v20, %v2772_v55  ;;  %v1215_v48 = vmax.f32 %v1096_v56, 0.0  ;;  %v2866_v20 = vpop.permute.xlu1 %1247 }
 0x1fb   : > { %v1101_v9 = vpop.f32.mrf.mxu0  ;;  %v1190_v40 = vpop.f32.mrf.mxu1  ;;  %v1217_v10 = vmax.f32 %v1185_v58, 0.0 }
 0x1fc   : > { %v1102_v26 = vadd.f32 %v1101_v9, %v2756_v37  ;;  %v1191_v30 = vadd.f32 %v1190_v40, %v2756_v37  ;;  %v1216_v62 = vmax.f32 %v1098_v33, 0.0  ;;  %v1218_v8 = vmax.f32 %v1187_v43, 0.0 }
 0x1fd   : > { %v1103_v57 = vpop.f32.mrf.mxu0  ;;  %v1192_v38 = vpop.f32.mrf.mxu1  ;;  %v1199_v23 = vmax.f32 %v1084_v34, 0.0 }
 0x1fe   : > { %v1104_v36 = vadd.f32 %v1103_v57, %v2756_v37  ;;  %v1193_v2 = vadd.f32 %v1192_v38, %v2756_v37  ;;  %v1223_v3 = vmax.f32 %v1102_v26, 0.0  ;;  %v1225_v54 = vmax.f32 %v1191_v30, 0.0  ;;  %v2880_v57 = vpop.permute.xlu1 %1237 }
 0x1ff   : > { %v1175_v37 = vadd.f32 %v1174_v28, %v2772_v55 }
 0x200   : > { %v1224_v47 = vmax.f32 %v1104_v36, 0.0  ;;  %v1226_v1 = vmax.f32 %v1193_v2, 0.0 }
 0x201   : > { %v1202_v22 = vmax.f32 %v1175_v37, 0.0 }
 0x202   : > { %1470 = vmatprep.subr.mxu0 %v1224_v47  ;;  %1559 = vmatprep.subr.mxu1 %v1226_v1 }
 0x203   : > { %1471 = vmatpush1.msra.mxu0 %v1223_v3  ;;  %1560 = vmatpush1.msra.mxu1 %v1225_v54 }
 0x204   : > { %1472 = vmatprep.subr.mxu0 %v1216_v62  ;;  %1561 = vmatprep.subr.mxu1 %v1218_v8 }
 0x205   : > { %1473 = vmatpush1.msra.mxu0 %v1215_v48  ;;  %1562 = vmatpush1.msra.mxu1 %v1217_v10 }
 0x206   : > { %1474 = vmatprep.subr.mxu0 %v1208_v31  ;;  %1563 = vmatprep.subr.mxu1 %v1210_v51 }
 0x207   : > { %1475 = vmatpush1.msra.mxu0 %v1207_v18  ;;  %1564 = vmatpush1.msra.mxu1 %v1209_v32 }
 0x208   : > { %1476 = vmatprep.subr.mxu0 %v1200_v11  ;;  %1565 = vmatprep.subr.mxu1 %v1202_v22 }
 0x209   : > { %1477 = vmatpush1.msra.mxu0 %v1199_v23  ;;  %1566 = vmatpush1.msra.mxu1 %v1201_v46 }
 0x20a   : > { %2141 = vmatmul.mubr.msk.f32.vlgmr.msra.gmra.mxu0 %vm1255_vm3, %v2783_v61  ;;  %2145 = vmatmul.mubr.msk.f32.vlgmr.msra.gmra.mxu1 %vm1255_vm3, %v2783_v61 }
 0x20b   : > { %1516 = vmatprep.mubr.f32.mxu0 %v2269_v0  ;;  %1605 = vmatprep.mubr.f32.mxu1 %v2269_v0 }
 0x20e   : > { %2142 = vmatmul.mubr.msk.f32.gmra.mxu0 %vm1255_vm3, %v2794_v49  ;;  %2146 = vmatmul.mubr.msk.f32.gmra.mxu1 %vm1255_vm3, %v2794_v49 }
 0x20f   : > { %1522 = vmatprep.mubr.f32.mxu0 %v2269_v0  ;;  %1611 = vmatprep.mubr.f32.mxu1 %v2269_v0 }
 0x212   : > { %2143 = vmatmul.mubr.msk.f32.gmra.mxu0 %vm1255_vm3, %v2805_v41  ;;  %2147 = vmatmul.mubr.msk.f32.gmra.mxu1 %vm1255_vm3, %v2805_v41 }
 0x213   : > { %1528 = vmatprep.mubr.f32.mxu0 %v2269_v0  ;;  %1617 = vmatprep.mubr.f32.mxu1 %v2269_v0 }
 0x216   : > { %2144 = vmatmul.mubr.msk.f32.gmra.mxu0 %vm1255_vm3, %v2816_v16  ;;  %2148 = vmatmul.mubr.msk.f32.gmra.mxu1 %vm1255_vm3, %v2816_v16 }
 0x217   : > { %1730 = vmatprep.mubr.f32.mxu0 %v2269_v0  ;;  %1801 = vmatprep.mubr.f32.mxu1 %v2269_v0 }
 0x2aa   : > { %v1334_v55 = vpop.f32.mrf.mxu0  ;;  %v1423_v14 = vpop.f32.mrf.mxu1 }
 0x2ab   : > { %v1335_v7 = vadd.f32 %v1334_v55, %v2880_v57  ;;  %v1424_v47 = vadd.f32 %v1423_v14, %v2880_v57 }
 0x2ac   : > { %v1336_v12 = vpop.f32.mrf.mxu0  ;;  %v1425_v29 = vpop.f32.mrf.mxu1 }
 0x2ad   : > { %v1337_v2 = vadd.f32 %v1336_v12, %v2880_v57  ;;  %v1426_v56 = vadd.f32 %v1425_v29, %v2880_v57  ;;  %v1624_v8 = vmax.f32 %v1335_v7, 0.0  ;;  %v1626_v34 = vmax.f32 %v1424_v47, 0.0 }
 0x2ae   : > { %v1340_v13 = vpop.f32.mrf.mxu0  ;;  %v1429_v15 = vpop.f32.mrf.mxu1 }
 0x2af   : > { %v1341_v38 = vadd.f32 %v1340_v13, %v2874_v63  ;;  %v1430_v33 = vadd.f32 %v1429_v15, %v2874_v63  ;;  %v1625_v37 = vmax.f32 %v1337_v2, 0.0  ;;  %v1627_v62 = vmax.f32 %v1426_v56, 0.0 }
 0x2b0   : > { %v1342_v4 = vpop.f32.mrf.mxu0  ;;  %v1431_v6 = vpop.f32.mrf.mxu1 }
 0x2b1   : > { %v1343_v9 = vadd.f32 %v1342_v4, %v2874_v63  ;;  %v1432_v40 = vadd.f32 %v1431_v6, %v2874_v63  ;;  %v1632_v54 = vmax.f32 %v1341_v38, 0.0  ;;  %v1634_v5 = vmax.f32 %v1430_v33, 0.0 }
 0x2b2   : > { %v1346_v44 = vpop.f32.mrf.mxu0  ;;  %v1435_v19 = vpop.f32.mrf.mxu1 }
 0x2b3   : > { %v1347_v50 = vadd.f32 %v1346_v44, %v2866_v20  ;;  %v1436_v39 = vadd.f32 %v1435_v19, %v2866_v20  ;;  %v1633_v52 = vmax.f32 %v1343_v9, 0.0  ;;  %v1635_v3 = vmax.f32 %v1432_v40, 0.0 }
 0x2b4   : > { %v1348_v61 = vpop.f32.mrf.mxu0  ;;  %v1437_v49 = vpop.f32.mrf.mxu1 }
 0x2b5   : > { %v1349_v16 = vadd.f32 %v1348_v61, %v2866_v20  ;;  %v1438_v25 = vadd.f32 %v1437_v49, %v2866_v20  ;;  %v1640_v1 = vmax.f32 %v1347_v50, 0.0  ;;  %v1642_v60 = vmax.f32 %v1436_v39, 0.0 }
 0x2b6   : > { %v1352_v21 = vpop.f32.mrf.mxu0  ;;  %v1441_v41 = vpop.f32.mrf.mxu1 }
 0x2b7   : > { %v1353_v27 = vadd.f32 %v1352_v21, %v2864_v59  ;;  %v1442_v28 = vadd.f32 %v1441_v41, %v2864_v59  ;;  %v1641_v58 = vmax.f32 %v1349_v16, 0.0  ;;  %v1643_v53 = vmax.f32 %v1438_v25, 0.0 }
 0x2b8   : > { %v1354_v42 = vpop.f32.mrf.mxu0  ;;  %v1443_v24 = vpop.f32.mrf.mxu1 }
 0x2b9   : > { %v1355_v17 = vadd.f32 %v1354_v42, %v2864_v59  ;;  %v1444_v45 = vadd.f32 %v1443_v24, %v2864_v59  ;;  %v1648_v43 = vmax.f32 %v1353_v27, 0.0  ;;  %v1650_v36 = vmax.f32 %v1442_v28, 0.0 }
 0x2bb   : > { %v1649_v26 = vmax.f32 %v1355_v17, 0.0  ;;  %v1651_v30 = vmax.f32 %v1444_v45, 0.0 }
 0x2bd   : > { %1690 = vmatprep.subr.mxu0 %v1649_v26  ;;  %1761 = vmatprep.subr.mxu1 %v1651_v30 }
 0x2be   : > { %1691 = vmatpush1.msra.mxu0 %v1648_v43  ;;  %1762 = vmatpush1.msra.mxu1 %v1650_v36 }
 0x2bf   : > { %1692 = vmatprep.subr.mxu0 %v1641_v58  ;;  %1763 = vmatprep.subr.mxu1 %v1643_v53  ;;  %v1963_v53 = vlaneseq }
 0x2c0   : > { %1693 = vmatpush1.msra.mxu0 %v1640_v1  ;;  %1764 = vmatpush1.msra.mxu1 %v1642_v60 }
 0x2c1   : > { %1694 = vmatprep.subr.mxu0 %v1633_v52  ;;  %1765 = vmatprep.subr.mxu1 %v1635_v3  ;;  %v1964_v47 = vshrl.u32 %v1963_v53, 7  ;;  %v1661_v52 = vpop.permute.xlu0 %1660 }
 0x2c2   : > { %1695 = vmatpush1.msra.mxu0 %v1632_v54  ;;  %1766 = vmatpush1.msra.mxu1 %v1634_v5 }
 0x2c3   : > { %1696 = vmatprep.subr.mxu0 %v1625_v37  ;;  %1767 = vmatprep.subr.mxu1 %v1627_v62 }
 0x2c4   : > { %1697 = vmatpush1.msra.mxu0 %v1624_v8  ;;  %1768 = vmatpush1.msra.mxu1 %v1626_v34 }
 0x2c5   : > { %2149 = vmatmul.mubr.msk.f32.vlgmr.msra.gmra.mxu0 %vm1255_vm3, %v2891_v35  ;;  %2150 = vmatmul.mubr.msk.f32.vlgmr.msra.gmra.mxu1 %vm1255_vm3, %v2891_v35 }
 0x2c6   : > { %1872 = vmatprep.mubr.f32.mxu0 %v2269_v0  ;;  %1943 = vmatprep.mubr.f32.mxu1 %v2269_v0 }
 0x2ca   : > { %v1512_v48 = vpop.f32.mrf.mxu0  ;;  %v1601_v10 = vpop.f32.mrf.mxu1 }
 0x2cb   : > { %v1602_v9 = vadd.f32 %v1601_v10, %v2880_v57 }
 0x2cc   : > { %v1514_v31 = vpop.f32.mrf.mxu0  ;;  %v1603_v51 = vpop.f32.mrf.mxu1 }
 0x2cd   : > { %v1515_v45 = vadd.f32 %v1514_v31, %v2880_v57  ;;  %v1630_v56 = vmax.f32 %v1602_v9, 0.0 }
 0x2ce   : > { %v1518_v18 = vpop.f32.mrf.mxu0  ;;  %v1607_v32 = vpop.f32.mrf.mxu1 }
 0x2cf   : > { %v1519_v24 = vadd.f32 %v1518_v18, %v2874_v63  ;;  %v1608_v16 = vadd.f32 %v1607_v32, %v2874_v63  ;;  %v1629_v43 = vmax.f32 %v1515_v45, 0.0 }
 0x2d0   : > { %v1520_v11 = vpop.f32.mrf.mxu0  ;;  %v1609_v22 = vpop.f32.mrf.mxu1 }
 0x2d1   : > { %v1521_v41 = vadd.f32 %v1520_v11, %v2874_v63  ;;  %v1610_v27 = vadd.f32 %v1609_v22, %v2874_v63  ;;  %v1636_v38 = vmax.f32 %v1519_v24, 0.0  ;;  %v1638_v33 = vmax.f32 %v1608_v16, 0.0 }
 0x2d2   : > { %v1524_v23 = vpop.f32.mrf.mxu0  ;;  %v1613_v46 = vpop.f32.mrf.mxu1 }
 0x2d3   : > { %v1525_v49 = vadd.f32 %v1524_v23, %v2866_v20  ;;  %v1614_v21 = vadd.f32 %v1613_v46, %v2866_v20  ;;  %v1637_v30 = vmax.f32 %v1521_v41, 0.0  ;;  %v1639_v63 = vmax.f32 %v1610_v27, 0.0 }
 0x2d4   : > { %v1526_v55 = vpop.f32.mrf.mxu0  ;;  %v1615_v14 = vpop.f32.mrf.mxu1 }
 0x2d5   : > { %v1527_v6 = vadd.f32 %v1526_v55, %v2866_v20  ;;  %v1616_v44 = vadd.f32 %v1615_v14, %v2866_v20  ;;  %v1513_v20 = vadd.f32 %v1512_v48, %v2880_v57  ;;  %v1644_v40 = vmax.f32 %v1525_v49, 0.0 }
 0x2d6   : > { %v1530_v12 = vpop.f32.mrf.mxu0  ;;  %v1619_v29 = vpop.f32.mrf.mxu1  ;;  %v1646_v26 = vmax.f32 %v1614_v21, 0.0 }
 0x2d7   : > { %v1531_v13 = vadd.f32 %v1530_v12, %v2864_v59  ;;  %v1620_v15 = vadd.f32 %v1619_v29, %v2864_v59  ;;  %v1645_v50 = vmax.f32 %v1527_v6, 0.0  ;;  %v1647_v39 = vmax.f32 %v1616_v44, 0.0 }
 0x2d8   : > { %v1532_v4 = vpop.f32.mrf.mxu0  ;;  %v1621_v0 = vpop.f32.mrf.mxu1  ;;  %v1628_v2 = vmax.f32 %v1513_v20, 0.0 }
 0x2d9   : > { %v1533_v19 = vadd.f32 %v1532_v4, %v2864_v59  ;;  %v1622_v61 = vadd.f32 %v1621_v0, %v2864_v59  ;;  %v1652_v25 = vmax.f32 %v1531_v13, 0.0  ;;  %v1654_v17 = vmax.f32 %v1620_v15, 0.0 }
 0x2da   : > { %v1604_v59 = vadd.f32 %v1603_v51, %v2880_v57  ;;  %v2271_v57 = vmov 1983009808  }
 0x2db   : > { %v1653_v28 = vmax.f32 %v1533_v19, 0.0  ;;  %v1655_v42 = vmax.f32 %v1622_v61, 0.0  ;;  %v1961_v58 = vunpack.c.l.s4 %v2271_v57 }
 0x2dc   : > { %v1631_v36 = vmax.f32 %v1604_v59, 0.0 }
 0x2dd   : > { %1832 = vmatprep.subr.mxu0 %v1653_v28  ;;  %1903 = vmatprep.subr.mxu1 %v1655_v42  ;;  %v1962_v7 = vunpack.c.0.s8 %v1961_v58 }
 0x2de   : > { %1833 = vmatpush1.msra.mxu0 %v1652_v25  ;;  %1904 = vmatpush1.msra.mxu1 %v1654_v17 }
 0x2df   : > { %1834 = vmatprep.subr.mxu0 %v1645_v50  ;;  %1905 = vmatprep.subr.mxu1 %v1647_v39  ;;  %v1965_v54 = vsub.s32 %v1962_v7, %v1964_v47 }
 0x2e0   : > { %1835 = vmatpush1.msra.mxu0 %v1644_v40  ;;  %1906 = vmatpush1.msra.mxu1 %v1646_v26 }
 0x2e1   : > { %1836 = vmatprep.subr.mxu0 %v1637_v30  ;;  %1907 = vmatprep.subr.mxu1 %v1639_v63 }
 0x2e2   : > { %1837 = vmatpush1.msra.mxu0 %v1636_v38  ;;  %1908 = vmatpush1.msra.mxu1 %v1638_v33 }
 0x2e3   : > { %1838 = vmatprep.subr.mxu0 %v1629_v43  ;;  %1909 = vmatprep.subr.mxu1 %v1631_v36 }
 0x2e4   : > { %1839 = vmatpush1.msra.mxu0 %v1628_v2  ;;  %1910 = vmatpush1.msra.mxu1 %v1630_v56 }
 0x2e5   : > { %2151 = vmatmul.mubr.msk.f32.vlgmr.msra.gmra.mxu0 %vm1255_vm3, %v2891_v35  ;;  %2152 = vmatmul.mubr.msk.f32.vlgmr.msra.gmra.mxu1 %vm1255_vm3, %v2891_v35 }
 0x385   : > { %v1732_v1 = vpop.f32.mrf.mxu0  ;;  %v1803_v60 = vpop.f32.mrf.mxu1 }
 0x386   : > { %v1733_v37 = vadd.f32 %v1732_v1, %v1661_v52  ;;  %v1804_v62 = vadd.f32 %v1803_v60, %v1661_v52 }
 0x387   : > { %v1734_v3 = vpop.f32.mrf.mxu0  ;;  %v1805_v5 = vpop.f32.mrf.mxu1 }
 0x388   : > { %v1735_v8 = vadd.f32 %v1734_v3, %v1661_v52  ;;  %v1806_v34 = vadd.f32 %v1805_v5, %v1661_v52 }
 0x38a   : > { %v1958_v48 = vcombine.low %v1733_v37, %v1735_v8  ;;  %v1959_v10 = vcombine.low %v1804_v62, %v1806_v34 }
 0x38c   : > { %v1966_v35 = vrot.slane %v1958_v48, %v1965_v54  ;;  %v1973_v31 = vrot.slane %v1959_v10, %v1965_v54 }
 0x38e   : > { %v1974_v51 = vcombine.low %v1966_v35, %v1973_v31 }
 0x390   : > { %1994 = vst [vmem:[%s164_s27] sm:$0xff] %v1974_v51 }
 0x3a5   : > { %v1874_v18 = vpop.f32.mrf.mxu0  ;;  %v1945_v32 = vpop.f32.mrf.mxu1 }
 0x3a6   : > { %v1875_v23 = vadd.f32 %v1874_v18, %v1661_v52  ;;  %v1946_v46 = vadd.f32 %v1945_v32, %v1661_v52 }
 0x3a7   : > { %v1876_v11 = vpop.f32.mrf.mxu0  ;;  %v1947_v22 = vpop.f32.mrf.mxu1 }
 0x3a8   : > { %v1877_v55 = vadd.f32 %v1876_v11, %v1661_v52  ;;  %v1948_v14 = vadd.f32 %v1947_v22, %v1661_v52 }
 0x3aa   : > { %v1975_v12 = vcombine.low %v1875_v23, %v1877_v55  ;;  %v1976_v29 = vcombine.low %v1946_v46, %v1948_v14 }
 0x3ac   : > { %v1983_v13 = vrot.slane %v1975_v12, %v1965_v54  ;;  %v1990_v15 = vrot.slane %v1976_v29, %v1965_v54 }
 0x3ae   : > { %v1991_v4 = vcombine.low %v1983_v13, %v1990_v15 }
 0x3b0   : > { %1995 = vst [vmem:[%s164_s27 + $0x8] sm:$0xff] %v1991_v4 }
 0x3b1   : > { %2220 = shalt.err (!%p2217_p3)
}
 0x3b2   : > { %s2221_s10 = scalar_lea.hbm %s2009_s5, 256  ;;  %s2225_s19 = scalar_lea.hbm %s2960_s3, 512 }
 0x3b3   : > { %p2222_p4 = scmp.ne.s32.totalorder %s2009_s5, %s2221_s10  ;;  %p2226_p9 = scmp.lt.s32.totalorder %s2009_s5, %s2960_s3 }
 0x3b4   : > { %p2227_p10 = scmp.lt.s32.totalorder %s2225_s19, %s2221_s10 }
 0x3b5   : > { %p2223_p7 = pnand %p2222_p4, %p2331_p5 }
 0x3b6   : > { %p2228_p11 = por %p2227_p10, %p2226_p9 }
 0x3b7   : > { %p2224_p8 = pneg %p2223_p7 }
 0x3b9   : > { %p2229_p12 = pnand %p2228_p11, %p2224_p8 }
 0x3bb   : > { %2232 = shalt.err (!%p2229_p12)
}
 0x3bc   : > { %2159 = dma.vmem_to_hbm [thread:$0]  (%p2331_p5), %s2012_s29, 256, %s2009_s5, %s1997_s6  }
 0x3bd PF: > { %p2165_p13 = scmp.ge.s32.totalorder %s2267_s15, 2  ;;  %s2023_s25 = sand.u32 1, %s2255_s12  }
 0x3be   : > { %s2024_s26 = scalar_lea.sflag [#allocation3], %s2023_s25 }
 0x3bf   : > { %p2162_p0 = pnand %p2165_p13, %p2335_p6 }
 0x3c1   : > { %p2163_p1 = pneg %p2162_p0 }
 0x3c3   : > { %2250 = dma.done.wait (%p2163_p1), %s2024_s26, 256  }
 0x3c4   : > { %2252 = vsyncadd (%p2163_p1), %s2024_s26, 4294967040  ;;  %p13_p2 = scmp.ge.s32.totalorder %s2318_s18, 4   ;;  %s2963_s12 = smov %s2259_s13 }
 0x3c5   : > { %s2964_s13 = smov %s2263_s14  ;;  %s2965_s14 = smov %s2329_s21 }
 0x3c6   : > { %s2966_s15 = smov %s2318_s18  ;;  %15 = sbr.rel (!%p13_p2) target bundleno = 3 (0x3), region = 67 }
 0x3cb   :  { %2029 = vsyncpa [#allocation3], 1 }
 0x3cc   :  { %2031 = vsyncpa [#allocation3 + $0x1], 1 }

</bundles_post_ra>
